<compile_context>
chip_gen: v7x
topology: tpu7x:2x2x1
jax: 0.10.0
libtpu: 0.0.40
codegen_flags: <defaults>
</compile_context>

<pallas_src>
import functools

import jax
import jax.numpy as jnp
from jax.experimental import pallas as pl
from jax.experimental.pallas import tpu as pltpu


def generator_kernel(x_ref, w1_ref, b1_ref, w2_ref, b2_ref, w3_ref, b3_ref,
                     out_ref):
    # One batch tile per grid step; all three matmuls + activations fused.
    # Matmul operands are bf16 (MXU native), accumulation/bias-add in f32.
    x = x_ref[...].astype(jnp.bfloat16)
    h1 = jnp.dot(x, w1_ref[...], preferred_element_type=jnp.float32) + b1_ref[...]
    h1 = jnp.maximum(h1, 0.0).astype(jnp.bfloat16)                     # ReLU
    h2 = jnp.dot(h1, w2_ref[...], preferred_element_type=jnp.float32) + b2_ref[...]
    h2 = jnp.maximum(h2, 0.0).astype(jnp.bfloat16)                     # ReLU
    y = jnp.dot(h2, w3_ref[...], preferred_element_type=jnp.float32) + b3_ref[...]
    out_ref[...] = jnp.tanh(y).astype(out_ref.dtype)                   # Tanh


def _round_up(n, m):
    return ((n + m - 1) // m) * m


def _pick_batch_tile(B, tm_cap):
    """Batch tile: multiple of 16 (bf16 sublane pack), grows with B, keeps the
    grid length >= 2 whenever B allows it (v7x megacore + DMA/compute overlap),
    capped by tm_cap (VMEM-safe)."""
    b16 = _round_up(B, 16)
    if b16 <= 16:
        return 16
    half = _round_up((b16 + 1) // 2, 16)          # -> at least 2 grid steps
    return max(16, min(_round_up(tm_cap, 16), half))


def prepare_params(params):
    """One-time parameter prep (call once, reuse for every forward):
      * weights -> bf16 (MXU-native operands),
      * layer-3 weight/bias lane dim padded to a multiple of 128 so the
        output store stays lane-dense,
      * biases kept f32 (added to the f32 accumulator)."""
    w1 = params["w1"].astype(jnp.bfloat16)
    w2 = params["w2"].astype(jnp.bfloat16)
    w3 = params["w3"].astype(jnp.bfloat16)
    b1 = params["b1"].astype(jnp.float32).reshape(1, -1)
    b2 = params["b2"].astype(jnp.float32).reshape(1, -1)
    b3 = params["b3"].astype(jnp.float32).reshape(1, -1)
    out_dim = w3.shape[1]
    out_dim_p = _round_up(out_dim, 128)
    if out_dim_p != out_dim:
        w3 = jnp.pad(w3, ((0, 0), (0, out_dim_p - out_dim)))
        b3 = jnp.pad(b3, ((0, 0), (0, out_dim_p - out_dim)))
    return {"w1": w1, "b1": b1, "w2": w2, "b2": b2, "w3": w3, "b3": b3}


@functools.partial(jax.jit, static_argnames=("out_dim", "tm", "out_dtype"))
def generator_forward(x, prep, *, out_dim=None, tm=1024,
                      out_dtype=jnp.bfloat16):
    """x: (B, input_dim) f32; prep: output of prepare_params (bf16 weights,
    f32 biases, lane-padded layer 3).  Returns (B, out_dim) out_dtype."""
    w1, b1 = prep["w1"], prep["b1"]
    w2, b2 = prep["w2"], prep["b2"]
    w3, b3 = prep["w3"], prep["b3"]

    B, in_dim = x.shape
    out_dim_p = w3.shape[1]                    # lane-padded (multiple of 128)
    if out_dim is None:
        out_dim = out_dim_p

    # Batch tile / grid.  x stays f32 with its native K (full-dim block is
    # legal); the bf16 cast happens in-kernel.
    tm_eff = _pick_batch_tile(B, tm)
    bp = _round_up(B, tm_eff)
    if bp != B:
        x = jnp.pad(x, ((0, bp - B), (0, 0)))
    grid = (bp // tm_eff,)

    # Weights/biases: full block, constant block index -> DMA'd once,
    # VMEM-resident across all grid steps.
    const = lambda shape: pl.BlockSpec(shape, lambda i: (0,) * len(shape))

    out_bytes = jnp.dtype(out_dtype).itemsize
    cost = pl.CostEstimate(
        flops=2 * bp * (in_dim * 128 + 128 * 256 + 256 * out_dim_p),
        transcendentals=bp * out_dim_p,
        bytes_accessed=(
            bp * in_dim * 4                                   # x (f32)
            + (in_dim * 128 + 128 * 256 + 256 * out_dim_p) * 2  # weights bf16
            + (128 + 256 + out_dim_p) * 4                     # biases f32
            + bp * out_dim_p * out_bytes),                    # output
    )

    out = pl.pallas_call(
        generator_kernel,
        out_shape=jax.ShapeDtypeStruct((bp, out_dim_p), out_dtype),
        grid=grid,
        in_specs=[
            pl.BlockSpec((tm_eff, in_dim), lambda i: (i, 0)),  # x: batch-tiled
            const(w1.shape), const(b1.shape),
            const(w2.shape), const(b2.shape),
            const(w3.shape), const(b3.shape),
        ],
        out_specs=pl.BlockSpec((tm_eff, out_dim_p), lambda i: (i, 0)),
        compiler_params=pltpu.CompilerParams(
            dimension_semantics=("parallel",),
        ),
        cost_estimate=cost,
    )(x, w1, b1, w2, b2, w3, b3)
    return out[:B, :out_dim]


def init_params(key, input_dim, output_dim):
    """Deterministic PyTorch-style init: U(-1/sqrt(fan_in), 1/sqrt(fan_in))."""
    dims = [(input_dim, 128), (128, 256), (256, output_dim)]
    params = {}
    keys = jax.random.split(key, 2 * len(dims))
    for i, (fan_in, fan_out) in enumerate(dims):
        bound = 1.0 / jnp.sqrt(float(fan_in))
        params[f"w{i+1}"] = jax.random.uniform(
            keys[2 * i], (fan_in, fan_out), jnp.float32, -bound, bound)
        params[f"b{i+1}"] = jax.random.uniform(
            keys[2 * i + 1], (1, fan_out), jnp.float32, -bound, bound)
    return params


def generator_reference(x, p):
    """Pure-JAX reference matching the kernel's matmul numerics
    (bf16 operands, f32 accumulation, f32 bias add)."""
    q = lambda a: a.astype(jnp.bfloat16).astype(jnp.float32)
    h1 = jnp.maximum(q(x) @ q(p["w1"]) + p["b1"], 0.0)
    h2 = jnp.maximum(q(h1) @ q(p["w2"]) + p["b2"], 0.0)
    return jnp.tanh(q(h2) @ q(p["w3"]) + p["b3"])


if __name__ == "__main__":
    input_dim = 64        # latent noise dimension fed to the Generator
    output_dim = 1024     # as in the reference script
    batch = 64            # small; tile picker gives 2 grid steps of 32 rows

    key = jax.random.PRNGKey(0)
    k_params, k_x = jax.random.split(key)
    params = init_params(k_params, input_dim, output_dim)
    prep = jax.tree_util.tree_map(jax.block_until_ready,
                                  prepare_params(params))  # one-time prep
    x = jax.random.normal(k_x, (batch, input_dim), jnp.float32)

    out = generator_forward(x, prep, out_dim=output_dim)
    out = jax.block_until_ready(out)

    ref = generator_reference(x, params)
    assert out.shape == (batch, output_dim)
    assert out.dtype == jnp.bfloat16
    out_f32 = out.astype(jnp.float32)
    max_err = float(jnp.max(jnp.abs(out_f32 - ref)))
    assert jnp.allclose(out_f32, ref, atol=2e-2, rtol=2e-2), (
        f"mismatch vs reference, max abs err = {max_err}")

    print("KERNEL_OK")
</pallas_src>

<mosaic_0001>
module attributes {stable_mosaic.version = 11 : i64} {
  func.func @generator_kernel(%arg0: i32, %arg1: memref<32x64xf32, #tpu.memory_space<vmem>>, %arg2: memref<64x128xbf16, #tpu.memory_space<vmem>>, %arg3: memref<1x128xf32, #tpu.memory_space<vmem>>, %arg4: memref<128x256xbf16, #tpu.memory_space<vmem>>, %arg5: memref<1x256xf32, #tpu.memory_space<vmem>>, %arg6: memref<256x1024xbf16, #tpu.memory_space<vmem>>, %arg7: memref<1x1024xf32, #tpu.memory_space<vmem>>, %arg8: memref<32x1024xbf16, #tpu.memory_space<vmem>>) attributes {dimension_semantics = [#tpu.dimension_semantics<parallel>], iteration_bounds = array<i64: 2>, scalar_prefetch = 0 : i64, scratch_operands = 0 : i64, tpu.core_type = #tpu.core_type<tc>, window_params = [{transform_indices = @transform_0, window_bounds = array<i64: 32, 64>}, {pipeline_mode = #tpu.pipeline_mode<synchronous>, transform_indices = @transform_1, window_bounds = array<i64: 64, 128>}, {pipeline_mode = #tpu.pipeline_mode<synchronous>, transform_indices = @transform_2, window_bounds = array<i64: 1, 128>}, {pipeline_mode = #tpu.pipeline_mode<synchronous>, transform_indices = @transform_3, window_bounds = array<i64: 128, 256>}, {pipeline_mode = #tpu.pipeline_mode<synchronous>, transform_indices = @transform_4, window_bounds = array<i64: 1, 256>}, {pipeline_mode = #tpu.pipeline_mode<synchronous>, transform_indices = @transform_5, window_bounds = array<i64: 256, 1024>}, {pipeline_mode = #tpu.pipeline_mode<synchronous>, transform_indices = @transform_6, window_bounds = array<i64: 1, 1024>}, {transform_indices = @transform_7, window_bounds = array<i64: 32, 1024>}]} {
    %c0 = arith.constant 0 : index
    %c0_0 = arith.constant 0 : index
    %0 = vector.load %arg1[%c0, %c0_0] : memref<32x64xf32, #tpu.memory_space<vmem>>, vector<32x64xf32>
    %1 = arith.truncf %0 : vector<32x64xf32> to vector<32x64xbf16>
    %c0_1 = arith.constant 0 : index
    %c0_2 = arith.constant 0 : index
    %2 = vector.load %arg2[%c0_1, %c0_2] : memref<64x128xbf16, #tpu.memory_space<vmem>>, vector<64x128xbf16>
    %cst = arith.constant dense<0.000000e+00> : vector<32x128xf32>
    %3 = tpu.matmul %1, %2, %cst {dimension_numbers = #tpu.dot_dimension_numbers<[1], [0], [0], [1], [0, 0, 1, 1], [], []>} : vector<32x64xbf16>, vector<64x128xbf16>, vector<32x128xf32> -> vector<32x128xf32>
    %c0_3 = arith.constant 0 : index
    %c0_4 = arith.constant 0 : index
    %4 = vector.load %arg3[%c0_3, %c0_4] : memref<1x128xf32, #tpu.memory_space<vmem>>, vector<1x128xf32>
    %5 = vector.broadcast %4 : vector<1x128xf32> to vector<32x128xf32>
    %6 = arith.addf %3, %5 : vector<32x128xf32>
    %cst_5 = arith.constant 0.000000e+00 : f32
    %7 = vector.broadcast %cst_5 : f32 to vector<32x128xf32>
    %8 = arith.maximumf %6, %7 : vector<32x128xf32>
    %9 = arith.truncf %8 : vector<32x128xf32> to vector<32x128xbf16>
    %c0_6 = arith.constant 0 : index
    %c0_7 = arith.constant 0 : index
    %10 = vector.load %arg4[%c0_6, %c0_7] : memref<128x256xbf16, #tpu.memory_space<vmem>>, vector<128x256xbf16>
    %cst_8 = arith.constant dense<0.000000e+00> : vector<32x256xf32>
    %11 = tpu.matmul %9, %10, %cst_8 {dimension_numbers = #tpu.dot_dimension_numbers<[1], [0], [0], [1], [0, 0, 1, 1], [], []>} : vector<32x128xbf16>, vector<128x256xbf16>, vector<32x256xf32> -> vector<32x256xf32>
    %c0_9 = arith.constant 0 : index
    %c0_10 = arith.constant 0 : index
    %12 = vector.load %arg5[%c0_9, %c0_10] : memref<1x256xf32, #tpu.memory_space<vmem>>, vector<1x256xf32>
    %13 = vector.broadcast %12 : vector<1x256xf32> to vector<32x256xf32>
    %14 = arith.addf %11, %13 : vector<32x256xf32>
    %cst_11 = arith.constant 0.000000e+00 : f32
    %15 = vector.broadcast %cst_11 : f32 to vector<32x256xf32>
    %16 = arith.maximumf %14, %15 : vector<32x256xf32>
    %17 = arith.truncf %16 : vector<32x256xf32> to vector<32x256xbf16>
    %c0_12 = arith.constant 0 : index
    %c0_13 = arith.constant 0 : index
    %18 = vector.load %arg6[%c0_12, %c0_13] : memref<256x1024xbf16, #tpu.memory_space<vmem>>, vector<256x1024xbf16>
    %cst_14 = arith.constant dense<0.000000e+00> : vector<32x1024xf32>
    %19 = tpu.matmul %17, %18, %cst_14 {dimension_numbers = #tpu.dot_dimension_numbers<[1], [0], [0], [1], [0, 0, 1, 1], [], []>} : vector<32x256xbf16>, vector<256x1024xbf16>, vector<32x1024xf32> -> vector<32x1024xf32>
    %c0_15 = arith.constant 0 : index
    %c0_16 = arith.constant 0 : index
    %20 = vector.load %arg7[%c0_15, %c0_16] : memref<1x1024xf32, #tpu.memory_space<vmem>>, vector<1x1024xf32>
    %21 = vector.broadcast %20 : vector<1x1024xf32> to vector<32x1024xf32>
    %22 = arith.addf %19, %21 : vector<32x1024xf32>
    %23 = math.tanh %22 : vector<32x1024xf32>
    %24 = arith.truncf %23 : vector<32x1024xf32> to vector<32x1024xbf16>
    %c0_17 = arith.constant 0 : index
    %c0_18 = arith.constant 0 : index
    %25 = vector.load %arg8[%c0_17, %c0_18] : memref<32x1024xbf16, #tpu.memory_space<vmem>>, vector<32x1024xbf16>
    tpu.vector_store %arg8[%c0_17, %c0_18], %24 {strides = array<i32>} : memref<32x1024xbf16, #tpu.memory_space<vmem>>, vector<32x1024xbf16>,
    return
  }
  func.func @transform_0(%arg0: i32) -> (i32, i32) {
    %c0_i32 = arith.constant 0 : i32
    %c0_i32_0 = arith.constant 0 : i32
    return %arg0, %c0_i32 : i32, i32
  }
  func.func @transform_1(%arg0: i32) -> (i32, i32) {
    %c0_i32 = arith.constant 0 : i32
    %c0_i32_0 = arith.constant 0 : i32
    %c0_i32_1 = arith.constant 0 : i32
    return %c0_i32, %c0_i32_0 : i32, i32
  }
  func.func @transform_2(%arg0: i32) -> (i32, i32) {
    %c0_i32 = arith.constant 0 : i32
    %c0_i32_0 = arith.constant 0 : i32
    %c0_i32_1 = arith.constant 0 : i32
    return %c0_i32, %c0_i32_0 : i32, i32
  }
  func.func @transform_3(%arg0: i32) -> (i32, i32) {
    %c0_i32 = arith.constant 0 : i32
    %c0_i32_0 = arith.constant 0 : i32
    %c0_i32_1 = arith.constant 0 : i32
    return %c0_i32, %c0_i32_0 : i32, i32
  }
  func.func @transform_4(%arg0: i32) -> (i32, i32) {
    %c0_i32 = arith.constant 0 : i32
    %c0_i32_0 = arith.constant 0 : i32
    %c0_i32_1 = arith.constant 0 : i32
    return %c0_i32, %c0_i32_0 : i32, i32
  }
  func.func @transform_5(%arg0: i32) -> (i32, i32) {
    %c0_i32 = arith.constant 0 : i32
    %c0_i32_0 = arith.constant 0 : i32
    %c0_i32_1 = arith.constant 0 : i32
    return %c0_i32, %c0_i32_0 : i32, i32
  }
  func.func @transform_6(%arg0: i32) -> (i32, i32) {
    %c0_i32 = arith.constant 0 : i32
    %c0_i32_0 = arith.constant 0 : i32
    %c0_i32_1 = arith.constant 0 : i32
    return %c0_i32, %c0_i32_0 : i32, i32
  }
  func.func @transform_7(%arg0: i32) -> (i32, i32) {
    %c0_i32 = arith.constant 0 : i32
    %c0_i32_0 = arith.constant 0 : i32
    return %arg0, %c0_i32 : i32, i32
  }
}

</mosaic_0001>

<bundles_post_ra>
// kernel: generator_forward.1
= control target key start
LH: loop header
LB: loop body
LE: loop exit
PB: predicated region body
PF: predicated region fallthrough
CT: control target
= control target key end

     0   :  { %s2912_s0 = inlined_call_operand.hbm [shape: f32[64,64], index: 0, kind: input, shape index: {}]   ;;  %s2913_s1 = inlined_call_operand.hbm [shape: bf16[64,128], index: 1, kind: input, shape index: {}]   ;;  %s2914_s2 = inlined_call_operand.vmem [shape: f32[1,128], index: 2, kind: input, shape index: {}]   ;;  %s2915_s3 = inlined_call_operand.hbm [shape: bf16[128,256], index: 3, kind: input, shape index: {}]   ;;  %s2916_s4 = inlined_call_operand.vmem [shape: f32[1,256], index: 4, kind: input, shape index: {}]   ;;  %s2917_s5 = inlined_call_operand.hbm [shape: bf16[256,1024], index: 5, kind: input, shape index: {}]   ;;  %s2918_s6 = inlined_call_operand.vmem [shape: f32[1,1024], index: 6, kind: input, shape index: {}]   ;;  %s2919_s7 = inlined_call_operand.hbm [shape: bf16[64,1024], index: 7, kind: output, shape index: {}]  }
   0x1   :  { %2923 = sst [smem:[#allocation15_spill]] %s2913_s1 }
   0x2   :  { %12 = vsyncpa [#allocation3], 0 }
   0x3   :  { %14 = vsyncpa [#allocation3 + $0x1], 0 }
   0x4   :  { %15 = vsyncpa [#allocation6], 0 }
   0x5   :  { %16 = vsyncpa [#allocation9], 0 }
   0x6   :  { %17 = vsyncpa [#allocation4], 0 }
   0x7   :  { %19 = vsyncpa [#allocation4 + $0x1], 0  ;;  %s2554_s24 = smov 0   ;;  %s2556_s25 = smov 0  }
   0x8   :  { %s2558_s26 = smov 0   ;;  %s2560_s27 = smov 0  }
   0x9 LB: > { %s2575_s28 = sadd.s32 4294967295, %s2498_s27   ;;  %s1907_s29 = sadd.s32 4294967294, %s2498_s27   ;;  %s2498_s27 = sphi %s2560_s27, %s2944_s27   ;;  %s2494_s26 = sphi %s2558_s26, %s2943_s26   ;;  %s2490_s25 = sphi %s2556_s25, %s2942_s25   ;;  %s2486_s24 = sphi %s2554_s24, %s2941_s24  }
   0xa   : > { %p45_p0 = scmp.ne.s32.totalorder %s2490_s25, %s2486_s24  ;;  %p2920_p1 = scmp.eq.s32.totalorder %s2575_s28, 0 }
   0xb   : > { %p201_p3 = scmp.eq.s32.totalorder %s1907_s29, 1  ;;  %p1908_p5 = scmp.ge.s32.totalorder %s2498_s27, 1 }
   0xc   : > { %p2584_p4 = por %p2920_p1, %p45_p0  ;;  %p208_p7 = scmp.lt.s32.totalorder %s2498_s27, 3 }
   0xd   : > { %p2589_p6 = por %p201_p3, %p45_p0  ;;  %s2500_s10 = smov [#allocation5]  }
   0xe   : > { %s2924_s30 = scalar_select %p2584_p4, 1, 0 }
   0xf   : > { %s2925_s8 = scalar_select %p2589_p6, 1, 0 }
  0x10   : > { %p2594_p8 = pnand %p1908_p5, %p208_p7  ;;  %s220_s11 = sshll.u32 %s2500_s10, 4  ;;  %s2598_s11 = int_to_ptr.vmem [resolvable:$true] %s220_s11 }
  0x11   : > { %s2501_s13 = smov [#allocation7]   ;;  %s2928_s1 = sld [smem:[#allocation15_spill]] }
  0x12   : > { %s2926_s9 = scalar_select %p2594_p8, 1, 0 }
  0x13   : > { %p2148_p9 = pneg %p2594_p8  ;;  %s236_s14 = sshll.u32 %s2501_s13, 4  ;;  %s2609_s14 = int_to_ptr.vmem [resolvable:$true] %s236_s14 }
  0x15   : > { %p2605_p11 = pnand %p2148_p9, %p2920_p1 }
  0x17   : > { %s2310_s17 = scalar_lea.hbm %s2928_s1, 512  ;;  %p2619_p13 = pneg %p2605_p11 }
  0x18   : > { %p2311_p12 = scmp.ne.s32.totalorder %s2928_s1, %s2310_s17  ;;  %p2317_p5 = scmp.lt.u32.totalorder %s2310_s17, %s2928_s1 }
  0x1a   : > { %p2313_p0 = pnand %p2619_p13, %p2311_p12 }
  0x1c   : > { %p2314_p3 = pneg %p2313_p0 }
  0x1e   : > { %p2319_p7 = pnand %p2317_p5, %p2314_p3 }
  0x20   : > { %2322 = shalt.err (!%p2319_p7)
}
  0x21   : > { %s2323_s23 = scalar_lea.vmem %s2598_s11, 512  ;;  %p2331_p2 = scmp.lt.s32.totalorder %s2598_s11, %s2598_s11 }
  0x22   : > { %p2324_p9 = scmp.ne.s32.totalorder %s2598_s11, %s2323_s23  ;;  %p2332_p6 = scmp.lt.s32.totalorder %s2323_s23, %s2323_s23 }
  0x24   : > { %p2326_p10 = pnand %p2324_p9, %p2619_p13  ;;  %p2333_p12 = por %p2332_p6, %p2331_p2 }
  0x26   : > { %p2327_p1 = pneg %p2326_p10 }
  0x28   : > { %p2334_p0 = pnand %p2333_p12, %p2327_p1 }
  0x2a   : > { %2337 = shalt.err (!%p2334_p0)
}
  0x2b   : > { %s2502_s29 = smov 64   ;;  %s2503_s10 = smov 4  }
  0x2c   : > { %2151 = dma.hbm_to_vmem [thread:$0]  (!%p2605_p11), %s2928_s1, 512, %s2598_s11, [#allocation6], %s2502_s29, %s2502_s29, %s2503_s10  }
  0x2d   : > { %s2338_s18 = scalar_lea.hbm %s2915_s3, 2048 }
  0x2e   : > { %p2339_p2 = scmp.ne.s32.totalorder %s2915_s3, %s2338_s18  ;;  %p2345_p10 = scmp.lt.u32.totalorder %s2338_s18, %s2915_s3 }
  0x30   : > { %p2341_p1 = pnand %p2339_p2, %p2619_p13 }
  0x32   : > { %p2342_p6 = pneg %p2341_p1 }
  0x34   : > { %p2347_p3 = pnand %p2345_p10, %p2342_p6 }
  0x36   : > { %2350 = shalt.err (!%p2347_p3)
}
  0x37   : > { %s2351_s11 = scalar_lea.vmem %s2609_s14, 2048  ;;  %p2359_p12 = scmp.lt.s32.totalorder %s2609_s14, %s2609_s14 }
  0x38   : > { %p2352_p5 = scmp.ne.s32.totalorder %s2609_s14, %s2351_s11  ;;  %p2360_p0 = scmp.lt.s32.totalorder %s2351_s11, %s2351_s11 }
  0x3a   : > { %p2354_p7 = pnand %p2352_p5, %p2619_p13  ;;  %p2361_p2 = por %p2360_p0, %p2359_p12 }
  0x3c   : > { %p2355_p9 = pneg %p2354_p7 }
  0x3e   : > { %p2362_p1 = pnand %p2361_p2, %p2355_p9 }
  0x40   : > { %2365 = shalt.err (!%p2362_p1)
}
  0x41   : > { %s2504_s29 = smov 128   ;;  %s2505_s10 = smov 8  }
  0x42   : > { %2154 = dma.hbm_to_vmem [thread:$0]  (!%p2605_p11), %s2915_s3, 2048, %s2609_s14, [#allocation6], %s2504_s29, %s2504_s29, %s2505_s10  }
  0x43   : > { %s2506_s16 = smov [#allocation8]   ;;  %s2366_s21 = scalar_lea.hbm %s2917_s5, 16384 }
  0x44   : > { %s252_s17 = sshll.u32 %s2506_s16, 4  ;;  %p2367_p6 = scmp.ne.s32.totalorder %s2917_s5, %s2366_s21  ;;  %s253_s17 = int_to_ptr.vmem [resolvable:$true] %s252_s17 }
  0x45   : > { %p2373_p5 = scmp.lt.u32.totalorder %s2366_s21, %s2917_s5 }
  0x46   : > { %p2369_p10 = pnand %p2367_p6, %p2619_p13 }
  0x48   : > { %p2370_p3 = pneg %p2369_p10 }
  0x4a   : > { %p2375_p7 = pnand %p2373_p5, %p2370_p3 }
  0x4c   : > { %2378 = shalt.err (!%p2375_p7)
}
  0x4d   : > { %s2379_s14 = scalar_lea.vmem %s253_s17, 16384  ;;  %p2387_p2 = scmp.lt.s32.totalorder %s253_s17, %s253_s17 }
  0x4e   : > { %p2380_p9 = scmp.ne.s32.totalorder %s253_s17, %s2379_s14  ;;  %p2388_p1 = scmp.lt.s32.totalorder %s2379_s14, %s2379_s14 }
  0x50   : > { %p2382_p12 = pnand %p2380_p9, %p2619_p13  ;;  %p2389_p4 = por %p2388_p1, %p2387_p2 }
  0x52   : > { %p2383_p0 = pneg %p2382_p12 }
  0x54   : > { %p2390_p8 = pnand %p2389_p4, %p2383_p0 }
  0x56   : > { %2393 = shalt.err (!%p2390_p8)
}
  0x57   : > { %s2507_s13 = smov 512   ;;  %s2508_s1 = smov 32  }
  0x58   : > { %2157 = dma.hbm_to_vmem [thread:$0]  (!%p2605_p11), %s2917_s5, 16384, %s253_s17, [#allocation9], %s2507_s13, %s2507_s13, %s2508_s1  }
  0x59   : > { %s2685_s16 = sadd.s32 1, %s2498_s27   ;;  %s32_s19 = sadd.s32 1, %s2494_s26 }
  0x5a   : > { %s29_s18 = ssub.s32 %s2498_s27, %s2685_s16  ;;  %p39_p8 = scmp.ne.s32.totalorder %s2494_s26, %s2490_s25 }
  0x5b   : > { %p30_p4 = scmp.eq.s32.totalorder %s29_s18, 0  ;;  %p40_p13 = scmp.eq.s32.totalorder %s2498_s27, 0 }
  0x5c   : > { %p2169_p6 = scmp.lt.s32.totalorder %s2498_s27, 2  ;;  %p2930_p3 = scmp.eq.s32.totalorder %s2575_s28, 1 }
  0x5d   : > { %s2695_s21 = scalar_select %p30_p4, %s2494_s26, %s32_s19  }
  0x5e   : > { %p41_p10 = por %p40_p13, %p39_p8  ;;  %p2699_p5 = por %p2930_p3, %p39_p8 }
  0x5f   : > { %s269_s12 = sand.u32 1, %s2494_s26   ;;  %s2095_s23 = sshll.u32 %s2498_s27, 9 }
  0x60   : > { %s1913_s17 = sshll.u32 %s269_s12, 5  ;;  %s2708_s13 = scalar_lea.hbm %s2912_s0, %s2095_s23 }
  0x61   : > { %s273_s1 = scalar_lea.vmem [#allocation2], %s1913_s17  ;;  %p2710_p11 = pnand %p2169_p6, %p41_p10 }
  0x62   : > { %s280_s20 = sshll.u32 %s273_s1, 4  ;;  %s2716_s18 = scalar_lea.sflag [#allocation3], %s269_s12  ;;  %s2714_s20 = int_to_ptr.vmem [resolvable:$true] %s280_s20 }
  0x63   : > { %s2394_s19 = scalar_lea.hbm %s2708_s13, 512  ;;  %p2396_p9 = pneg %p2710_p11 }
  0x64   : > { %p2395_p7 = scmp.ne.s32.totalorder %s2708_s13, %s2394_s19  ;;  %s2399_s11 = scalar_lea.hbm %s2912_s0, 1024 }
  0x65   : > { %p2400_p2 = scmp.lt.u32.totalorder %s2708_s13, %s2912_s0  ;;  %p2401_p1 = scmp.lt.u32.totalorder %s2399_s11, %s2394_s19 }
  0x66   : > { %p2397_p12 = pnand %p2396_p9, %p2395_p7  ;;  %p2403_p8 = scmp.lt.u32.totalorder %s2394_s19, %s2708_s13 }
  0x67   : > { %p2402_p4 = por %p2401_p1, %p2400_p2 }
  0x68   : > { %p2398_p0 = pneg %p2397_p12 }
  0x69   : > { %p2404_p13 = por %p2403_p8, %p2402_p4 }
  0x6b   : > { %p2405_p6 = pnand %p2404_p13, %p2398_p0 }
  0x6d   : > { %2408 = shalt.err (!%p2405_p6)
}
  0x6e   : > { %s2409_s12 = scalar_lea.vmem %s2714_s20, 512  ;;  %s2509_s23 = smov [#allocation2]  }
  0x6f   : > { %p2410_p10 = scmp.ne.s32.totalorder %s2714_s20, %s2409_s12  ;;  %s2414_s17 = sshll.u32 %s2509_s23, 4  ;;  %s2415_s17 = int_to_ptr.vmem [resolvable:$false] %s2414_s17 }
  0x70   : > { %s2416_s14 = scalar_lea.vmem %s2415_s17, 1024  ;;  %p2417_p12 = scmp.lt.s32.totalorder %s2714_s20, %s2415_s17 }
  0x71   : > { %p2412_p3 = pnand %p2410_p10, %p2396_p9  ;;  %p2418_p2 = scmp.lt.s32.totalorder %s2416_s14, %s2409_s12 }
  0x73   : > { %p2413_p7 = pneg %p2412_p3  ;;  %p2419_p1 = por %p2418_p2, %p2417_p12 }
  0x75   : > { %p2420_p4 = pnand %p2419_p1, %p2413_p7 }
  0x77   : > { %2423 = shalt.err (!%p2420_p4)
}
  0x78   : > { %2161 = dma.hbm_to_vmem [thread:$0]  (!%p2710_p11), %s2708_s13, 512, %s2714_s20, %s2716_s18, %s2504_s29, %s2504_s29, %s2505_s10  }
  0x79   : > { %p2933_p9 = scmp.ne.s32.totalorder %s2926_s9, 0 }
  0x7a   : > { %s2750_s19 = sand.u32 (!%p2933_p9), 1, %s2490_s25   ;;  %p2934_p0 = scmp.ne.s32.totalorder (!%p2933_p9), %s2924_s30, 0 }
  0x7b   : > { %292 = sbr.rel (%p2933_p9) target bundleno = 919 (0x397), region = 48  ;;  %s1917_s11 = sshll.u32 (!%p2933_p9), %s2750_s19, 5 }
  0x7c   : > { %s295_s1 = scalar_lea.sflag (!%p2933_p9), [#allocation3], %s2750_s19  ;;  %s2754_s12 = scalar_lea.vmem (!%p2933_p9), [#allocation2], %s1917_s11 }
  0x82   : > { %2469 = dma.done.wait (%p2934_p0), %s295_s1, 512  }
  0x83   : > { %2471 = vsyncadd (%p2934_p0), %s295_s1, 4294966784  ;;  %p2935_p11 = scmp.eq.s32.totalorder %s2575_s28, 0 }
  0x85   : > { %2473 = dma.done.wait (%p2935_p11), [#allocation6], 2560   ;;  %p2936_p8 = pmov %p2935_p11 }
  0x87   : > { %2475 = vsyncadd (%p2936_p8), [#allocation6], 4294964736  ;;  %p2937_p13 = pmov %p2936_p8 }
  0x88   : > { %p2938_p6 = pmov %p2936_p8 }
  0x89   : > { %2477 = dma.done.wait (%p2937_p13), [#allocation9], 16384  }
  0x8a   : > { %2479 = vsyncadd (%p2938_p6), [#allocation9], 4294950912  ;;  %v2218_v0 = vld [vmem:[#allocation5] sm:$0xff]   ;;  %v2219_v1 = vld [vmem:[#allocation5 + $0x8] sm:$0xff]   ;;  %vm389_vm0 = vcmask 523264   ;;  %v2510_v26 = vmov 0  }
  0x8b   : > { %2120 = vmatprep.subr.bf16.mxu0 %v2218_v0  ;;  %v2220_v2 = vld [vmem:[#allocation5 + $0x10] sm:$0xff]   ;;  %v344_v3 = vld [vmem:[%s2754_s12] sm:$0xff]  ;;  %v345_v4 = vld [vmem:[%s2754_s12 + $0x8] sm:$0xff]  ;;  %591 = vmatprep.mubr.bf16.mxu1 %v2510_v26  ;;  %s1921_s15 = sshll.u32 %s2750_s19, 7  ;;  %s2113_s23 = sshll.u32 %s2575_s28, 11 }
  0x8c   : > { %2121 = vmatpush3.bf16.msra.mxu0 %v2218_v0  ;;  %v348_v5 = vpack.c.bf16 %v345_v4, %v344_v3  ;;  %v2222_v6 = vld [vmem:[#allocation7 + $0x4] ss:$8 sps:$4 sm:$0xff]   ;;  %v2224_v7 = vld [vmem:[#allocation7] ss:$8 sps:$4 sm:$0xff]   ;;  %v2225_v8 = vld [vmem:[#allocation7 + $0x14] ss:$8 sps:$4 sm:$0xff]   ;;  %s2864_s1 = scalar_lea.hbm %s2919_s7, %s2113_s23 }
  0x8d   : > { %2122 = vmatprep.subr.bf16.mxu0 %v2219_v1  ;;  %v2221_v9 = vld [vmem:[#allocation5 + $0x18] sm:$0xff]   ;;  %559 = vmatprep.subr.bf16.mxu1 %v2222_v6  ;;  %v2228_v11 = vld [vmem:[#allocation7 + $0x24] ss:$8 sps:$4 sm:$0xff]   ;;  %v346_v12 = vld [vmem:[%s2754_s12 + $0x10] sm:$0xff]  ;;  %s2835_s18 = scalar_lea.vmem [#allocation10], %s1921_s15  ;;  %s1791_s28 = scalar_lea.sflag [#allocation4], %s2750_s19 }
  0x8e   : > { %2128 = vmatprep.mubr.msk.bf16.mxu0 %vm389_vm0, %v348_v5  ;;  %560 = vmatpush1.bf16.msra.mxu1 %v2224_v7  ;;  %v2227_v10 = vld [vmem:[#allocation7 + $0x10] ss:$8 sps:$4 sm:$0xff]   ;;  %v2230_v14 = vld [vmem:[#allocation7 + $0x20] ss:$8 sps:$4 sm:$0xff]   ;;  %v2231_v16 = vld [vmem:[#allocation7 + $0x34] ss:$8 sps:$4 sm:$0xff]  }
  0x8f   : > { %561 = vmatprep.subr.bf16.mxu1 %v2225_v8  ;;  %v347_v13 = vld [vmem:[%s2754_s12 + $0x18] sm:$0xff]  ;;  %v2234_v18 = vld [vmem:[#allocation7 + $0x44] ss:$8 sps:$4 sm:$0xff]   ;;  %v2236_v19 = vld [vmem:[#allocation7 + $0x40] ss:$8 sps:$4 sm:$0xff]   ;;  %s1805_s17 = sshll.u32 %s2835_s18, 4  ;;  %s2866_s17 = int_to_ptr.vmem [resolvable:$true] %s1805_s17 }
  0x90   : > { %2123 = vmatpush3.bf16.msra.mxu0 %v2219_v1  ;;  %v349_v15 = vpack.c.bf16 %v347_v13, %v346_v12  ;;  %v2233_v17 = vld [vmem:[#allocation7 + $0x30] ss:$8 sps:$4 sm:$0xff]   ;;  %v2237_v20 = vld [vmem:[#allocation7 + $0x54] ss:$8 sps:$4 sm:$0xff]   ;;  %v2240_v22 = vld [vmem:[#allocation7 + $0x64] ss:$8 sps:$4 sm:$0xff]  }
  0x91   : > { %2124 = vmatprep.subr.bf16.mxu0 %v2220_v2  ;;  %v2239_v21 = vld [vmem:[#allocation7 + $0x50] ss:$8 sps:$4 sm:$0xff]   ;;  %v2242_v23 = vld [vmem:[#allocation7 + $0x60] ss:$8 sps:$4 sm:$0xff]   ;;  %v2243_v24 = vld [vmem:[#allocation7 + $0x74] ss:$8 sps:$4 sm:$0xff]  }
  0x92   : > { %562 = vmatpush1.bf16.msra.mxu1 %v2227_v10  ;;  %v2245_v25 = vld [vmem:[#allocation7 + $0x70] ss:$8 sps:$4 sm:$0xff]   ;;  %v624_v27 = vld [vmem:[#allocation8] sm:$0xff]  ;;  %v2775_v29 = vld [vmem:[#allocation8 + $0x8] sm:$0xff]  ;;  %s2424_s12 = scalar_lea.vmem %s2866_s17, 2048  ;;  %s2511_s30 = smov [#allocation10]  }
  0x93   : > { %563 = vmatprep.subr.bf16.mxu1 %v2228_v11  ;;  %v628_v28 = vld [vmem:[#allocation8 + $0x20] sm:$0xff]  ;;  %v2777_v32 = vld [vmem:[#allocation8 + $0x28] sm:$0xff]  ;;  %p2425_p10 = scmp.ne.s32.totalorder %s2866_s17, %s2424_s12  ;;  %s2428_s9 = sshll.u32 %s2511_s30, 4  ;;  %s2429_s9 = int_to_ptr.vmem [resolvable:$false] %s2428_s9 }
  0x94   : > { %2125 = vmatpush3.bf16.msra.mxu0 %v2220_v2  ;;  %v1945_v30 = vcombine.low %v624_v27, %v628_v28  ;;  %v1946_v31 = vcombine.high %v624_v27, %v628_v28  ;;  %v632_v33 = vld [vmem:[#allocation8 + $0x40] sm:$0xff]  ;;  %v1947_v35 = vcombine.low %v2775_v29, %v2777_v32  ;;  %v1948_v36 = vcombine.high %v2775_v29, %v2777_v32  ;;  %s2430_s29 = scalar_lea.vmem %s2429_s9, 4096  ;;  %p2431_p12 = scmp.lt.s32.totalorder %s2866_s17, %s2429_s9 }
  0x95   : > { %2126 = vmatprep.subr.bf16.mxu0 %v2221_v9  ;;  %v636_v34 = vld [vmem:[#allocation8 + $0x60] sm:$0xff]  ;;  %p2426_p3 = pnand %p2425_p10, %p2699_p5  ;;  %p2432_p2 = scmp.lt.s32.totalorder %s2430_s29, %s2424_s12 }
  0x96   : > { %564 = vmatpush1.bf16.msra.mxu1 %v2230_v14  ;;  %v1954_v37 = vcombine.high %v632_v33, %v636_v34  ;;  %v640_v38 = vld [vmem:[#allocation8 + $0x80] sm:$0xff]  ;;  %v1953_v40 = vcombine.low %v632_v33, %v636_v34 }
  0x97   : > { %565 = vmatprep.subr.bf16.mxu1 %v2231_v16  ;;  %v644_v39 = vld [vmem:[#allocation8 + $0xa0] sm:$0xff]  ;;  %p2427_p7 = pneg %p2426_p3  ;;  %p2433_p1 = por %p2432_p2, %p2431_p12 }
  0x98   : > { %2127 = vmatpush3.bf16.msra.mxu0 %v2221_v9  ;;  %v1962_v41 = vcombine.high %v640_v38, %v644_v39  ;;  %v648_v42 = vld [vmem:[#allocation8 + $0xc0] sm:$0xff]  ;;  %v1961_v44 = vcombine.low %v640_v38, %v644_v39  ;;  %v633_v38 = vld [vmem:[#allocation8 + $0x48] sm:$0xff] }
  0x99   : > { %1434 = vmatprep.subr.bf16.mxu0 %v1946_v31  ;;  %v652_v43 = vld [vmem:[#allocation8 + $0xe0] sm:$0xff]  ;;  %v637_v39 = vld [vmem:[#allocation8 + $0x68] sm:$0xff]  ;;  %p2434_p4 = pnand %p2433_p1, %p2427_p7 }
  0x9a   : > { %566 = vmatpush1.bf16.msra.mxu1 %v2233_v17  ;;  %v1970_v45 = vcombine.high %v648_v42, %v652_v43  ;;  %v656_v46 = vld [vmem:[#allocation8 + $0x100] sm:$0xff]  ;;  %v1969_v48 = vcombine.low %v648_v42, %v652_v43 }
  0x9b   : > { %2129 = vmatmul.mubr.msk.bf16.vlgmr.msra.gmra.mrb[0].mxu0 %vm389_vm0, %v349_v15  ;;  %567 = vmatprep.subr.bf16.mxu1 %v2234_v18  ;;  %v660_v47 = vld [vmem:[#allocation8 + $0x120] sm:$0xff] }
  0x9c   : > { %1435 = vmatpush1.bf16.msra.mxu0 %v1945_v30  ;;  %v1978_v49 = vcombine.high %v656_v46, %v660_v47  ;;  %v664_v50 = vld [vmem:[#allocation8 + $0x140] sm:$0xff]  ;;  %v1977_v52 = vcombine.low %v656_v46, %v660_v47  ;;  %v645_v46 = vld [vmem:[#allocation8 + $0xa8] sm:$0xff]  ;;  %v1955_v47 = vcombine.low %v633_v38, %v637_v39 }
  0x9d   : > { %1436 = vmatprep.subr.bf16.mxu0 %v1954_v37  ;;  %v668_v51 = vld [vmem:[#allocation8 + $0x160] sm:$0xff] }
  0x9e   : > { %568 = vmatpush1.bf16.msra.mxu1 %v2236_v19  ;;  %v1986_v53 = vcombine.high %v664_v50, %v668_v51  ;;  %v672_v54 = vld [vmem:[#allocation8 + $0x180] sm:$0xff]  ;;  %v1985_v56 = vcombine.low %v664_v50, %v668_v51  ;;  %v653_v50 = vld [vmem:[#allocation8 + $0xe8] sm:$0xff] }
  0x9f   : > { %569 = vmatprep.subr.bf16.mxu1 %v2237_v20  ;;  %v676_v55 = vld [vmem:[#allocation8 + $0x1a0] sm:$0xff] }
  0xa0   : > { %1437 = vmatpush1.bf16.msra.mxu0 %v1953_v40  ;;  %v1994_v57 = vcombine.high %v672_v54, %v676_v55  ;;  %v680_v58 = vld [vmem:[#allocation8 + $0x1c0] sm:$0xff]  ;;  %v1993_v60 = vcombine.low %v672_v54, %v676_v55  ;;  %v661_v54 = vld [vmem:[#allocation8 + $0x128] sm:$0xff] }
  0xa1   : > { %1438 = vmatprep.subr.bf16.mxu0 %v1962_v41  ;;  %v684_v59 = vld [vmem:[#allocation8 + $0x1e0] sm:$0xff] }
  0xa2   : > { %570 = vmatpush1.bf16.msra.mxu1 %v2239_v21  ;;  %v2002_v61 = vcombine.high %v680_v58, %v684_v59  ;;  %v688_v62 = vld [vmem:[#allocation8 + $0x200] sm:$0xff]  ;;  %v2001_v0 = vcombine.low %v680_v58, %v684_v59  ;;  %v677_v58 = vld [vmem:[#allocation8 + $0x1a8] sm:$0xff] }
  0xa3   : > { %571 = vmatprep.subr.bf16.mxu1 %v2240_v22  ;;  %v692_v63 = vld [vmem:[#allocation8 + $0x220] sm:$0xff] }
  0xa4   : > { %1439 = vmatpush1.bf16.msra.mxu0 %v1961_v44  ;;  %v2010_v1 = vcombine.high %v688_v62, %v692_v63  ;;  %v696_v2 = vld [vmem:[#allocation8 + $0x240] sm:$0xff]  ;;  %v2009_v4 = vcombine.low %v688_v62, %v692_v63  ;;  %v1956_v44 = vcombine.high %v633_v38, %v637_v39  ;;  %v685_v62 = vld [vmem:[#allocation8 + $0x1e8] sm:$0xff] }
  0xa5   : > { %1440 = vmatprep.subr.bf16.mxu0 %v1970_v45  ;;  %v700_v3 = vld [vmem:[#allocation8 + $0x260] sm:$0xff]  ;;  %v641_v45 = vld [vmem:[#allocation8 + $0x88] sm:$0xff] }
  0xa6   : > { %572 = vmatpush1.bf16.msra.mxu1 %v2242_v23  ;;  %v2018_v5 = vcombine.high %v696_v2, %v700_v3  ;;  %v704_v6 = vld [vmem:[#allocation8 + $0x280] sm:$0xff]  ;;  %v2017_v8 = vcombine.low %v696_v2, %v700_v3  ;;  %v1963_v51 = vcombine.low %v641_v45, %v645_v46  ;;  %v693_v2 = vld [vmem:[#allocation8 + $0x228] sm:$0xff] }
  0xa7   : > { %573 = vmatprep.subr.bf16.mxu1 %v2243_v24  ;;  %v708_v7 = vld [vmem:[#allocation8 + $0x2a0] sm:$0xff] }
  0xa8   : > { %1441 = vmatpush1.bf16.msra.mxu0 %v1969_v48  ;;  %v2026_v9 = vcombine.high %v704_v6, %v708_v7  ;;  %v712_v10 = vld [vmem:[#allocation8 + $0x2c0] sm:$0xff]  ;;  %v2025_v12 = vcombine.low %v704_v6, %v708_v7  ;;  %v1964_v48 = vcombine.high %v641_v45, %v645_v46  ;;  %v701_v6 = vld [vmem:[#allocation8 + $0x268] sm:$0xff]  ;;  %v626_v46 = vld [vmem:[#allocation8 + $0x10] sm:$0xff] }
  0xa9   : > { %1442 = vmatprep.subr.bf16.mxu0 %v1978_v49  ;;  %v716_v11 = vld [vmem:[#allocation8 + $0x2e0] sm:$0xff]  ;;  %v649_v49 = vld [vmem:[#allocation8 + $0xc8] sm:$0xff] }
  0xaa   : > { %574 = vmatpush1.bf16.msra.mxu1 %v2245_v25  ;;  %v2034_v13 = vcombine.high %v712_v10, %v716_v11  ;;  %v720_v14 = vld [vmem:[#allocation8 + $0x300] sm:$0xff]  ;;  %v2033_v16 = vcombine.low %v712_v10, %v716_v11  ;;  %v1971_v55 = vcombine.low %v649_v49, %v653_v50  ;;  %v709_v10 = vld [vmem:[#allocation8 + $0x2a8] sm:$0xff] }
  0xab   : > { %1487 = vmatprep.subr.bf16.mxu1 %v1948_v36  ;;  %v724_v15 = vld [vmem:[#allocation8 + $0x320] sm:$0xff] }
  0xac   : > { %1443 = vmatpush1.bf16.msra.mxu0 %v1977_v52  ;;  %v2042_v17 = vcombine.high %v720_v14, %v724_v15  ;;  %v728_v18 = vld [vmem:[#allocation8 + $0x340] sm:$0xff]  ;;  %v2041_v20 = vcombine.low %v720_v14, %v724_v15  ;;  %v1972_v52 = vcombine.high %v649_v49, %v653_v50  ;;  %v717_v14 = vld [vmem:[#allocation8 + $0x2e8] sm:$0xff]  ;;  %v631_v50 = vld [vmem:[#allocation8 + $0x38] sm:$0xff] }
  0xad   : > { %1444 = vmatprep.subr.bf16.mxu0 %v1986_v53  ;;  %v732_v19 = vld [vmem:[#allocation8 + $0x360] sm:$0xff]  ;;  %v657_v53 = vld [vmem:[#allocation8 + $0x108] sm:$0xff] }
  0xae   : > { %v2050_v21 = vcombine.high %v728_v18, %v732_v19  ;;  %v2049_v22 = vcombine.low %v728_v18, %v732_v19  ;;  %v1922_v23 = vld [vmem:[%s2914_s2] ss:$0 sm:$0xff]  ;;  %v1979_v29 = vcombine.low %v657_v53, %v661_v54  ;;  %v725_v18 = vld [vmem:[#allocation8 + $0x328] sm:$0xff] }
  0xaf   : > { %v744_v38 = vld [vmem:[#allocation8 + $0x3c0] sm:$0xff] }
  0xb0   : > { %1445 = vmatpush1.bf16.msra.mxu0 %v1985_v56  ;;  %v665_v56 = vld [vmem:[#allocation8 + $0x148] sm:$0xff]  ;;  %v748_v39 = vld [vmem:[#allocation8 + $0x3e0] sm:$0xff] }
  0xb1   : > { %1446 = vmatprep.subr.bf16.mxu0 %v1994_v57  ;;  %v669_v57 = vld [vmem:[#allocation8 + $0x168] sm:$0xff] }
  0xb2   : > { %v1988_v32 = vcombine.high %v665_v56, %v669_v57  ;;  %v1987_v59 = vcombine.low %v665_v56, %v669_v57  ;;  %v467_v56 = vld [vmem:[%s2916_s4] sm:$0x3] }
  0xb4   : > { %1447 = vmatpush1.bf16.msra.mxu0 %v1993_v60 }
  0xb5   : > { %1448 = vmatprep.subr.bf16.mxu0 %v2002_v61  ;;  %v681_v61 = vld [vmem:[#allocation8 + $0x1c8] sm:$0xff] }
  0xb6   : > { %v2003_v3 = vcombine.low %v681_v61, %v685_v62 }
  0xb8   : > { %1449 = vmatpush1.bf16.msra.mxu0 %v2001_v0  ;;  %v2004_v0 = vcombine.high %v681_v61, %v685_v62 }
  0xb9   : > { %1450 = vmatprep.subr.bf16.mxu0 %v2010_v1  ;;  %v689_v1 = vld [vmem:[#allocation8 + $0x208] sm:$0xff] }
  0xba   : > { %v2011_v7 = vcombine.low %v689_v1, %v693_v2 }
  0xbc   : > { %1451 = vmatpush1.bf16.msra.mxu0 %v2009_v4  ;;  %v2012_v4 = vcombine.high %v689_v1, %v693_v2 }
  0xbd   : > { %1452 = vmatprep.subr.bf16.mxu0 %v2018_v5  ;;  %v697_v5 = vld [vmem:[#allocation8 + $0x248] sm:$0xff] }
  0xbe   : > { %v2019_v11 = vcombine.low %v697_v5, %v701_v6 }
  0xc0   : > { %1453 = vmatpush1.bf16.msra.mxu0 %v2017_v8  ;;  %v2020_v8 = vcombine.high %v697_v5, %v701_v6  ;;  %v638_v6 = vld [vmem:[#allocation8 + $0x70] sm:$0xff] }
  0xc1   : > { %1454 = vmatprep.subr.bf16.mxu0 %v2026_v9  ;;  %v705_v9 = vld [vmem:[#allocation8 + $0x288] sm:$0xff] }
  0xc2   : > { %v2027_v15 = vcombine.low %v705_v9, %v709_v10 }
  0xc4   : > { %1455 = vmatpush1.bf16.msra.mxu0 %v2025_v12  ;;  %v2028_v12 = vcombine.high %v705_v9, %v709_v10 }
  0xc5   : > { %1456 = vmatprep.subr.bf16.mxu0 %v2034_v13  ;;  %v713_v13 = vld [vmem:[#allocation8 + $0x2c8] sm:$0xff] }
  0xc6   : > { %v2035_v19 = vcombine.low %v713_v13, %v717_v14 }
  0xc8   : > { %1457 = vmatpush1.bf16.msra.mxu0 %v2033_v16  ;;  %v2036_v16 = vcombine.high %v713_v13, %v717_v14 }
  0xc9   : > { %1458 = vmatprep.subr.bf16.mxu0 %v2042_v17  ;;  %v721_v17 = vld [vmem:[#allocation8 + $0x308] sm:$0xff] }
  0xcc   : > { %1459 = vmatpush1.bf16.msra.mxu0 %v2041_v20  ;;  %v2044_v20 = vcombine.high %v721_v17, %v725_v18 }
  0xcd   : > { %1460 = vmatprep.subr.bf16.mxu0 %v2050_v21  ;;  %v729_v21 = vld [vmem:[#allocation8 + $0x348] sm:$0xff] }
  0xd0   : > { %1461 = vmatpush1.bf16.msra.mxu0 %v2049_v22  ;;  %v733_v22 = vld [vmem:[#allocation8 + $0x368] sm:$0xff] }
 0x16e   : > { %v2130_v24 = vpop.f32.mrb[0].mxu0 }
 0x16f   : > { %v439_v25 = vadd.f32 %v2130_v24, %v1922_v23  ;;  %v430_v27 = vpop.f32.mrb[1].mxu0  ;;  %v2052_v24 = vcombine.high %v729_v21, %v733_v22 }
 0x170   : > { %v431_v28 = vadd.f32 %v1922_v23, %v430_v27  ;;  %v2131_v30 = vpop.f32.mrb[2].mxu0  ;;  %v736_v27 = vld [vmem:[#allocation8 + $0x380] sm:$0xff] }
 0x171   : > { %v442_v31 = vadd.f32 %v2131_v30, %v1922_v23  ;;  %v433_v33 = vpop.f32.mrb[3].mxu0  ;;  %v447_v36 = vmax.f32 %v439_v25, 0.0  ;;  %v2051_v25 = vcombine.low %v729_v21, %v733_v22  ;;  %v737_v30 = vld [vmem:[#allocation8 + $0x388] sm:$0xff]  ;;  %v647_v21 = vld [vmem:[#allocation8 + $0xb8] sm:$0xff] }
 0x172   : > { %v434_v34 = vadd.f32 %v1922_v23, %v433_v33  ;;  %v445_v40 = vmax.f32 %v431_v28, 0.0  ;;  %v2043_v23 = vcombine.low %v721_v17, %v725_v18  ;;  %v740_v28 = vld [vmem:[#allocation8 + $0x3a0] sm:$0xff]  ;;  %v741_v33 = vld [vmem:[#allocation8 + $0x3a8] sm:$0xff] }
 0x173   : > { %v448_v37 = vmax.f32 %v442_v31, 0.0  ;;  %v2058_v31 = vcombine.high %v736_v27, %v740_v28 }
 0x174   : > { %v446_v41 = vmax.f32 %v434_v34, 0.0  ;;  %v2057_v34 = vcombine.low %v736_v27, %v740_v28 }
 0x175   : > { %v450_v42 = vpack.c.bf16 %v448_v37, %v447_v36  ;;  %v2059_v36 = vcombine.low %v737_v30, %v741_v33  ;;  %v2060_v37 = vcombine.high %v737_v30, %v741_v33  ;;  %1462 = vmatprep.subr.bf16.mxu0 %v2058_v31 }
 0x176   : > { %v449_v43 = vpack.c.bf16 %v446_v41, %v445_v40  ;;  %1463 = vmatpush1.bf16.msra.mxu0 %v2057_v34  ;;  %v745_v40 = vld [vmem:[#allocation8 + $0x3c8] sm:$0xff]  ;;  %v2066_v41 = vcombine.high %v744_v38, %v748_v39 }
 0x178   : > { %592 = vmatmul.mubr.bf16.vlgmr.msra.gmra.mrb[0].mxu1 %v449_v43  ;;  %v2065_v43 = vcombine.low %v744_v38, %v748_v39  ;;  %1464 = vmatprep.subr.bf16.mxu0 %v2066_v41  ;;  %v654_v39 = vld [vmem:[#allocation8 + $0xf0] sm:$0xff]  ;;  %v655_v41 = vld [vmem:[#allocation8 + $0xf8] sm:$0xff] }
 0x179   : > { %601 = vmatprep.mubr.bf16.mxu1 %v2510_v26  ;;  %1488 = vmatpush1.bf16.msra.mxu1 %v1947_v35  ;;  %v1980_v26 = vcombine.high %v657_v53, %v661_v54  ;;  %v673_v35 = vld [vmem:[#allocation8 + $0x188] sm:$0xff]  ;;  %v469_v54 = vlaneseq }
 0x17a   : > { %1489 = vmatprep.subr.bf16.mxu1 %v1956_v44  ;;  %v1996_v60 = vcombine.high %v673_v35, %v677_v58  ;;  %v1995_v63 = vcombine.low %v673_v35, %v677_v58  ;;  %1465 = vmatpush1.bf16.msra.mxu0 %v2065_v43 }
 0x17d   : > { %1490 = vmatpush1.bf16.msra.mxu1 %v1955_v47  ;;  %v630_v47 = vld [vmem:[#allocation8 + $0x30] sm:$0xff] }
 0x17e   : > { %1491 = vmatprep.subr.bf16.mxu1 %v1964_v48  ;;  %v627_v48 = vld [vmem:[#allocation8 + $0x18] sm:$0xff]  ;;  %v1950_v49 = vcombine.high %v626_v46, %v630_v47 }
 0x17f   : > { %v1952_v53 = vcombine.high %v627_v48, %v631_v50 }
 0x180   : > { %602 = vmatmul.mubr.bf16.gmra.mrb[4].mxu1 %v450_v42  ;;  %v749_v42 = vld [vmem:[#allocation8 + $0x3e8] sm:$0xff]  ;;  %1540 = vmatprep.subr.bf16.mxu0 %v1950_v49  ;;  %v659_v49 = vld [vmem:[#allocation8 + $0x118] sm:$0xff] }
 0x181   : > { %1492 = vmatpush1.bf16.msra.mxu1 %v1963_v51  ;;  %v2067_v44 = vcombine.low %v745_v40, %v749_v42  ;;  %v2068_v45 = vcombine.high %v745_v40, %v749_v42  ;;  %v1949_v51 = vcombine.low %v626_v46, %v630_v47  ;;  %v651_v40 = vld [vmem:[#allocation8 + $0xd8] sm:$0xff] }
 0x182   : > { %1493 = vmatprep.subr.bf16.mxu1 %v1972_v52  ;;  %v1951_v52 = vcombine.low %v627_v48, %v631_v50  ;;  %v1976_v47 = vcombine.high %v651_v40, %v655_v41  ;;  %v662_v48 = vld [vmem:[#allocation8 + $0x130] sm:$0xff]  ;;  %v663_v50 = vld [vmem:[#allocation8 + $0x138] sm:$0xff] }
 0x185   : > { %1494 = vmatpush1.bf16.msra.mxu1 %v1971_v55  ;;  %v2790_v55 = vshrl.u32 %v469_v54, 7  ;;  %v1984_v54 = vcombine.high %v659_v49, %v663_v50 }
 0x186   : > { %1495 = vmatprep.subr.bf16.mxu1 %v1980_v26 }
 0x187   : > { %v471_v26 = vsub.s32 0, %v2790_v55  ;;  %v475_v57 = vsub.s32 1, %v2790_v55 }
 0x189   : > { %1496 = vmatpush1.bf16.msra.mxu1 %v1979_v29  ;;  %v472_v29 = vrot.slane %v467_v56, %v471_v26 }
 0x18a   : > { %1497 = vmatprep.subr.bf16.mxu1 %v1988_v32  ;;  %v476_v32 = vrot.slane %v467_v56, %v475_v57  ;;  %v666_v56 = vld [vmem:[#allocation8 + $0x150] sm:$0xff] }
 0x18d   : > { %1498 = vmatpush1.bf16.msra.mxu1 %v1987_v59 }
 0x18e   : > { %1499 = vmatprep.subr.bf16.mxu1 %v1996_v60 }
 0x191   : > { %1500 = vmatpush1.bf16.msra.mxu1 %v1995_v63 }
 0x192   : > { %1501 = vmatprep.subr.bf16.mxu1 %v2004_v0 }
 0x195   : > { %1502 = vmatpush1.bf16.msra.mxu1 %v2003_v3  ;;  %v634_v3 = vld [vmem:[#allocation8 + $0x50] sm:$0xff] }
 0x196   : > { %1503 = vmatprep.subr.bf16.mxu1 %v2012_v4  ;;  %v1958_v14 = vcombine.high %v634_v3, %v638_v6 }
 0x199   : > { %1504 = vmatpush1.bf16.msra.mxu1 %v2011_v7  ;;  %v635_v7 = vld [vmem:[#allocation8 + $0x58] sm:$0xff] }
 0x19a   : > { %1505 = vmatprep.subr.bf16.mxu1 %v2020_v8  ;;  %v639_v8 = vld [vmem:[#allocation8 + $0x78] sm:$0xff] }
 0x19b   : > { %v1959_v27 = vcombine.low %v635_v7, %v639_v8 }
 0x19d   : > { %1506 = vmatpush1.bf16.msra.mxu1 %v2019_v11 }
 0x19e   : > { %1507 = vmatprep.subr.bf16.mxu1 %v2028_v12 }
 0x1a1   : > { %1508 = vmatpush1.bf16.msra.mxu1 %v2027_v15  ;;  %v1960_v15 = vcombine.high %v635_v7, %v639_v8  ;;  %v686_v7 = vld [vmem:[#allocation8 + $0x1f0] sm:$0xff]  ;;  %v683_v8 = vld [vmem:[#allocation8 + $0x1d8] sm:$0xff] }
 0x1a2   : > { %1509 = vmatprep.subr.bf16.mxu1 %v2036_v16  ;;  %v642_v16 = vld [vmem:[#allocation8 + $0x90] sm:$0xff] }
 0x1a5   : > { %1510 = vmatpush1.bf16.msra.mxu1 %v2035_v19  ;;  %v646_v19 = vld [vmem:[#allocation8 + $0xb0] sm:$0xff] }
 0x1a6   : > { %1511 = vmatprep.subr.bf16.mxu1 %v2044_v20  ;;  %v643_v20 = vld [vmem:[#allocation8 + $0x98] sm:$0xff]  ;;  %v1966_v31 = vcombine.high %v642_v16, %v646_v19  ;;  %v1965_v43 = vcombine.low %v642_v16, %v646_v19  ;;  %v694_v16 = vld [vmem:[#allocation8 + $0x230] sm:$0xff] }
 0x1a7   : > { %v1968_v33 = vcombine.high %v643_v20, %v647_v21 }
 0x1a9   : > { %1512 = vmatpush1.bf16.msra.mxu1 %v2043_v23 }
 0x1aa   : > { %1513 = vmatprep.subr.bf16.mxu1 %v2052_v24 }
 0x1ad   : > { %1514 = vmatpush1.bf16.msra.mxu1 %v2051_v25  ;;  %v1957_v25 = vcombine.low %v634_v3, %v638_v6  ;;  %v682_v6 = vld [vmem:[#allocation8 + $0x1d0] sm:$0xff] }
 0x1ae   : > { %1515 = vmatprep.subr.bf16.mxu1 %v2060_v37  ;;  %v650_v37 = vld [vmem:[#allocation8 + $0xd0] sm:$0xff]  ;;  %v2005_v19 = vcombine.low %v682_v6, %v686_v7 }
 0x1af   : > { %v1974_v46 = vcombine.high %v650_v37, %v654_v39 }
 0x1b1   : > { %1516 = vmatpush1.bf16.msra.mxu1 %v2059_v36 }
 0x1b2   : > { %1517 = vmatprep.subr.bf16.mxu1 %v2068_v45  ;;  %v658_v45 = vld [vmem:[#allocation8 + $0x110] sm:$0xff] }
 0x1b5   : > { %1518 = vmatpush1.bf16.msra.mxu1 %v2067_v44  ;;  %v1967_v44 = vcombine.low %v643_v20, %v647_v21 }
 0x1b6   : > { %1593 = vmatprep.subr.bf16.mxu1 %v1952_v53  ;;  %v1982_v53 = vcombine.high %v658_v45, %v662_v48 }
 0x24b   : > { %v593_v35 = vpop.f32.mrb[0].mxu1 }
 0x24c   : > { %v594_v58 = vadd.f32 %v593_v35, %v472_v29  ;;  %v595_v59 = vpop.f32.mrb[1].mxu1  ;;  %v671_v35 = vld [vmem:[#allocation8 + $0x178] sm:$0xff] }
 0x24d   : > { %v596_v60 = vadd.f32 %v595_v59, %v476_v32  ;;  %v597_v61 = vpop.f32.mrb[2].mxu1  ;;  %v1983_v59 = vcombine.low %v659_v49, %v663_v50 }
 0x24e   : > { %v598_v62 = vadd.f32 %v597_v61, %v472_v29  ;;  %v599_v63 = vpop.f32.mrb[3].mxu1  ;;  %v612_v1 = vmax.f32 %v594_v58, 0.0  ;;  %v1981_v58 = vcombine.low %v658_v45, %v662_v48  ;;  %v714_v45 = vld [vmem:[#allocation8 + $0x2d0] sm:$0xff]  ;;  %v719_v48 = vld [vmem:[#allocation8 + $0x2f8] sm:$0xff] }
 0x24f   : > { %v600_v0 = vadd.f32 %v599_v63, %v476_v32  ;;  %v613_v4 = vmax.f32 %v596_v60, 0.0  ;;  %v678_v63 = vld [vmem:[#allocation8 + $0x1b0] sm:$0xff] }
 0x250   : > { %v614_v2 = vmax.f32 %v598_v62, 0.0  ;;  %v674_v62 = vld [vmem:[#allocation8 + $0x190] sm:$0xff] }
 0x251   : > { %v615_v5 = vmax.f32 %v600_v0, 0.0  ;;  %v675_v0 = vld [vmem:[#allocation8 + $0x198] sm:$0xff] }
 0x252   : > { %v2801_v9 = vpack.c.bf16 %v614_v2, %v612_v1  ;;  %v679_v1 = vld [vmem:[#allocation8 + $0x1b8] sm:$0xff] }
 0x253   : > { %v621_v10 = vpack.c.bf16 %v615_v5, %v613_v4  ;;  %v603_v11 = vpop.f32.mrb[4].mxu1  ;;  %v1998_v4 = vcombine.high %v674_v62, %v678_v63  ;;  %v2000_v5 = vcombine.high %v675_v0, %v679_v1 }
 0x254   : > { %v604_v12 = vadd.f32 %v603_v11, %v472_v29  ;;  %v605_v13 = vpop.f32.mrb[5].mxu1  ;;  %v1997_v11 = vcombine.low %v674_v62, %v678_v63  ;;  %v731_v62 = vld [vmem:[#allocation8 + $0x358] sm:$0xff] }
 0x255   : > { %v606_v17 = vadd.f32 %v605_v13, %v476_v32  ;;  %v607_v18 = vpop.f32.mrb[6].mxu1  ;;  %1466 = vmatprep.mubr.bf16.mxu0 %v621_v10  ;;  %1519 = vmatprep.mubr.bf16.mxu1 %v621_v10  ;;  %v2006_v13 = vcombine.high %v682_v6, %v686_v7  ;;  %v735_v63 = vld [vmem:[#allocation8 + $0x378] sm:$0xff] }
 0x256   : > { %v608_v22 = vadd.f32 %v607_v18, %v472_v29  ;;  %v609_v23 = vpop.f32.mrb[7].mxu1  ;;  %1467 = vmatmul.mubr.bf16.vlgmr.msra.gmra.mrb[4].mxu0 %v2801_v9  ;;  %1520 = vmatmul.mubr.bf16.vlgmr.msra.gmra.mrb[8].mxu1 %v2801_v9  ;;  %v616_v28 = vmax.f32 %v604_v12, 0.0  ;;  %v670_v29 = vld [vmem:[#allocation8 + $0x170] sm:$0xff]  ;;  %v1999_v12 = vcombine.low %v675_v0, %v679_v1  ;;  %v695_v18 = vld [vmem:[#allocation8 + $0x238] sm:$0xff] }
 0x257   : > { %v610_v24 = vadd.f32 %v609_v23, %v476_v32  ;;  %1541 = vmatpush1.bf16.msra.mxu0 %v1949_v51  ;;  %1594 = vmatpush1.bf16.msra.mxu1 %v1951_v52  ;;  %v617_v34 = vmax.f32 %v606_v17, 0.0  ;;  %v1973_v51 = vcombine.low %v650_v37, %v654_v39  ;;  %v1975_v52 = vcombine.low %v651_v40, %v655_v41  ;;  %v667_v32 = vld [vmem:[#allocation8 + $0x158] sm:$0xff]  ;;  %v698_v23 = vld [vmem:[#allocation8 + $0x250] sm:$0xff] }
 0x258   : > { %v618_v30 = vmax.f32 %v608_v22, 0.0  ;;  %1542 = vmatprep.subr.bf16.mxu0 %v1958_v14  ;;  %1595 = vmatprep.subr.bf16.mxu1 %v1960_v15  ;;  %v1990_v60 = vcombine.high %v666_v56, %v670_v29  ;;  %v1992_v61 = vcombine.high %v667_v32, %v671_v35  ;;  %v1989_v2 = vcombine.low %v666_v56, %v670_v29  ;;  %v690_v15 = vld [vmem:[#allocation8 + $0x210] sm:$0xff]  ;;  %v691_v17 = vld [vmem:[#allocation8 + $0x218] sm:$0xff] }
 0x259   : > { %v619_v36 = vmax.f32 %v610_v24, 0.0  ;;  %v1991_v3 = vcombine.low %v667_v32, %v671_v35  ;;  %v2014_v21 = vcombine.high %v690_v15, %v694_v16  ;;  %v2016_v22 = vcombine.high %v691_v17, %v695_v18  ;;  %v702_v24 = vld [vmem:[#allocation8 + $0x270] sm:$0xff]  ;;  %v707_v37 = vld [vmem:[#allocation8 + $0x298] sm:$0xff] }
 0x25a   : > { %v2805_v38 = vpack.c.bf16 %v618_v30, %v616_v28  ;;  %v2013_v28 = vcombine.low %v690_v15, %v694_v16  ;;  %v2015_v30 = vcombine.low %v691_v17, %v695_v18  ;;  %v711_v39 = vld [vmem:[#allocation8 + $0x2b8] sm:$0xff]  ;;  %v2021_v40 = vcombine.low %v698_v23, %v702_v24 }
 0x25b   : > { %v2807_v42 = vpack.c.bf16 %v619_v36, %v617_v34  ;;  %1543 = vmatpush1.bf16.msra.mxu0 %v1957_v25  ;;  %1596 = vmatpush1.bf16.msra.mxu1 %v1959_v27  ;;  %v699_v25 = vld [vmem:[#allocation8 + $0x258] sm:$0xff]  ;;  %v706_v34 = vld [vmem:[#allocation8 + $0x290] sm:$0xff]  ;;  %v2031_v50 = vcombine.low %v707_v37, %v711_v39 }
 0x25c   : > { %1544 = vmatprep.subr.bf16.mxu0 %v1966_v31  ;;  %1597 = vmatprep.subr.bf16.mxu1 %v1968_v33  ;;  %v703_v27 = vld [vmem:[#allocation8 + $0x278] sm:$0xff]  ;;  %v2022_v31 = vcombine.high %v698_v23, %v702_v24  ;;  %v710_v36 = vld [vmem:[#allocation8 + $0x2b0] sm:$0xff]  ;;  %v764_v23 = vsub.s32 2, %v2790_v55  ;;  %v2823_v24 = vld [vmem:[%s2918_s6] sm:$0xff] }
 0x25d   : > { %1476 = vmatprep.mubr.bf16.mxu0 %v2807_v42  ;;  %1529 = vmatprep.mubr.bf16.mxu1 %v2807_v42  ;;  %v2024_v33 = vcombine.high %v699_v25, %v703_v27  ;;  %v2023_v41 = vcombine.low %v699_v25, %v703_v27  ;;  %v2029_v49 = vcombine.low %v706_v34, %v710_v36  ;;  %v723_v56 = vld [vmem:[#allocation8 + $0x318] sm:$0xff]  ;;  %v768_v25 = vsub.s32 3, %v2790_v55 }
 0x25e   : > { %1477 = vmatmul.mubr.bf16.gmra.mrb[8].mxu0 %v2805_v38  ;;  %1530 = vmatmul.mubr.bf16.gmra.mrb[12].mxu1 %v2805_v38  ;;  %v727_v29 = vld [vmem:[#allocation8 + $0x338] sm:$0xff]  ;;  %v765_v27 = vrot.slane %v2823_v24, %v764_v23  ;;  %v772_v23 = vsub.s32 4, %v2790_v55 }
 0x25f   : > { %1545 = vmatpush1.bf16.msra.mxu0 %v1965_v43  ;;  %1598 = vmatpush1.bf16.msra.mxu1 %v1967_v44  ;;  %v2030_v43 = vcombine.high %v706_v34, %v710_v36  ;;  %v2032_v44 = vcombine.high %v707_v37, %v711_v39  ;;  %v2047_v1 = vcombine.low %v723_v56, %v727_v29  ;;  %v739_v6 = vld [vmem:[#allocation8 + $0x398] sm:$0xff] }
 0x260   : > { %1572 = vmatprep.mubr.bf16.mxu0 %v621_v10  ;;  %1625 = vmatprep.mubr.bf16.mxu1 %v621_v10  ;;  %v687_v10 = vld [vmem:[#allocation8 + $0x1f8] sm:$0xff] }
 0x261   : > { %1546 = vmatprep.subr.bf16.mxu0 %v1974_v46  ;;  %1599 = vmatprep.subr.bf16.mxu1 %v1976_v47  ;;  %v2008_v14 = vcombine.high %v683_v8, %v687_v10  ;;  %v2007_v20 = vcombine.low %v683_v8, %v687_v10  ;;  %v718_v46 = vld [vmem:[#allocation8 + $0x2f0] sm:$0xff]  ;;  %v715_v47 = vld [vmem:[#allocation8 + $0x2d8] sm:$0xff]  ;;  %v2055_v10 = vcombine.low %v731_v62, %v735_v63 }
 0x262   : > { %v2037_v32 = vcombine.low %v714_v45, %v718_v46  ;;  %v2039_v35 = vcombine.low %v715_v47, %v719_v48  ;;  %v743_v7 = vld [vmem:[#allocation8 + $0x3b8] sm:$0xff] }
 0x263   : > { %1547 = vmatpush1.bf16.msra.mxu0 %v1973_v51  ;;  %1600 = vmatpush1.bf16.msra.mxu1 %v1975_v52  ;;  %v2038_v51 = vcombine.high %v714_v45, %v718_v46  ;;  %v2040_v52 = vcombine.high %v715_v47, %v719_v48  ;;  %v747_v15 = vld [vmem:[#allocation8 + $0x3d8] sm:$0xff]  ;;  %v2063_v18 = vcombine.low %v739_v6, %v743_v7 }
 0x264   : > { %1548 = vmatprep.subr.bf16.mxu0 %v1982_v53  ;;  %1601 = vmatprep.subr.bf16.mxu1 %v1984_v54  ;;  %v722_v53 = vld [vmem:[#allocation8 + $0x310] sm:$0xff]  ;;  %v751_v16 = vld [vmem:[#allocation8 + $0x3f8] sm:$0xff] }
 0x265   : > { %v726_v54 = vld [vmem:[#allocation8 + $0x330] sm:$0xff] }
 0x266   : > { %v2045_v0 = vcombine.low %v722_v53, %v726_v54 }
 0x267   : > { %1549 = vmatpush1.bf16.msra.mxu0 %v1981_v58  ;;  %1602 = vmatpush1.bf16.msra.mxu1 %v1983_v59  ;;  %v2046_v58 = vcombine.high %v722_v53, %v726_v54  ;;  %v2048_v59 = vcombine.high %v723_v56, %v727_v29 }
 0x268   : > { %1550 = vmatprep.subr.bf16.mxu0 %v1990_v60  ;;  %1603 = vmatprep.subr.bf16.mxu1 %v1992_v61  ;;  %v730_v60 = vld [vmem:[#allocation8 + $0x350] sm:$0xff] }
 0x269   : > { %v734_v61 = vld [vmem:[#allocation8 + $0x370] sm:$0xff] }
 0x26a   : > { %v2053_v8 = vcombine.low %v730_v60, %v734_v61 }
 0x26b   : > { %1551 = vmatpush1.bf16.msra.mxu0 %v1989_v2  ;;  %1604 = vmatpush1.bf16.msra.mxu1 %v1991_v3  ;;  %v2054_v2 = vcombine.high %v730_v60, %v734_v61  ;;  %v2056_v3 = vcombine.high %v731_v62, %v735_v63 }
 0x26c   : > { %1552 = vmatprep.subr.bf16.mxu0 %v1998_v4  ;;  %1605 = vmatprep.subr.bf16.mxu1 %v2000_v5  ;;  %v738_v4 = vld [vmem:[#allocation8 + $0x390] sm:$0xff] }
 0x26d   : > { %v742_v5 = vld [vmem:[#allocation8 + $0x3b0] sm:$0xff] }
 0x26e   : > { %v2061_v17 = vcombine.low %v738_v4, %v742_v5 }
 0x26f   : > { %1553 = vmatpush1.bf16.msra.mxu0 %v1997_v11  ;;  %1606 = vmatpush1.bf16.msra.mxu1 %v1999_v12  ;;  %v2062_v11 = vcombine.high %v738_v4, %v742_v5  ;;  %v2064_v12 = vcombine.high %v739_v6, %v743_v7 }
 0x270   : > { %1554 = vmatprep.subr.bf16.mxu0 %v2006_v13  ;;  %1607 = vmatprep.subr.bf16.mxu1 %v2008_v14  ;;  %v746_v13 = vld [vmem:[#allocation8 + $0x3d0] sm:$0xff] }
 0x271   : > { %v750_v14 = vld [vmem:[#allocation8 + $0x3f0] sm:$0xff] }
 0x273   : > { %1555 = vmatpush1.bf16.msra.mxu0 %v2005_v19  ;;  %1608 = vmatpush1.bf16.msra.mxu1 %v2007_v20  ;;  %v2070_v19 = vcombine.high %v746_v13, %v750_v14  ;;  %v2072_v20 = vcombine.high %v747_v15, %v751_v16 }
 0x274   : > { %1556 = vmatprep.subr.bf16.mxu0 %v2014_v21  ;;  %1609 = vmatprep.subr.bf16.mxu1 %v2016_v22  ;;  %v2069_v21 = vcombine.low %v746_v13, %v750_v14  ;;  %v2071_v22 = vcombine.low %v747_v15, %v751_v16 }
 0x277   : > { %1557 = vmatpush1.bf16.msra.mxu0 %v2013_v28  ;;  %1610 = vmatpush1.bf16.msra.mxu1 %v2015_v30 }
 0x278   : > { %1558 = vmatprep.subr.bf16.mxu0 %v2022_v31  ;;  %1611 = vmatprep.subr.bf16.mxu1 %v2024_v33 }
 0x27b   : > { %1559 = vmatpush1.bf16.msra.mxu0 %v2021_v40  ;;  %1612 = vmatpush1.bf16.msra.mxu1 %v2023_v41 }
 0x27c   : > { %1560 = vmatprep.subr.bf16.mxu0 %v2030_v43  ;;  %1613 = vmatprep.subr.bf16.mxu1 %v2032_v44 }
 0x27f   : > { %1561 = vmatpush1.bf16.msra.mxu0 %v2029_v49  ;;  %1614 = vmatpush1.bf16.msra.mxu1 %v2031_v50 }
 0x280   : > { %1562 = vmatprep.subr.bf16.mxu0 %v2038_v51  ;;  %1615 = vmatprep.subr.bf16.mxu1 %v2040_v52 }
 0x283   : > { %1563 = vmatpush1.bf16.msra.mxu0 %v2037_v32  ;;  %1616 = vmatpush1.bf16.msra.mxu1 %v2039_v35 }
 0x284   : > { %1564 = vmatprep.subr.bf16.mxu0 %v2046_v58  ;;  %1617 = vmatprep.subr.bf16.mxu1 %v2048_v59 }
 0x287   : > { %1565 = vmatpush1.bf16.msra.mxu0 %v2045_v0  ;;  %1618 = vmatpush1.bf16.msra.mxu1 %v2047_v1 }
 0x288   : > { %1566 = vmatprep.subr.bf16.mxu0 %v2054_v2  ;;  %1619 = vmatprep.subr.bf16.mxu1 %v2056_v3 }
 0x28b   : > { %1567 = vmatpush1.bf16.msra.mxu0 %v2053_v8  ;;  %1620 = vmatpush1.bf16.msra.mxu1 %v2055_v10 }
 0x28c   : > { %1568 = vmatprep.subr.bf16.mxu0 %v2062_v11  ;;  %1621 = vmatprep.subr.bf16.mxu1 %v2064_v12 }
 0x28f   : > { %1569 = vmatpush1.bf16.msra.mxu0 %v2061_v17  ;;  %1622 = vmatpush1.bf16.msra.mxu1 %v2063_v18 }
 0x290   : > { %1570 = vmatprep.subr.bf16.mxu0 %v2070_v19  ;;  %1623 = vmatprep.subr.bf16.mxu1 %v2072_v20 }
 0x293   : > { %1571 = vmatpush1.bf16.msra.mxu0 %v2069_v21  ;;  %1624 = vmatpush1.bf16.msra.mxu1 %v2071_v22 }
 0x296   : > { %1573 = vmatmul.mubr.bf16.vlgmr.msra.gmra.mrb[12].mxu0 %v2801_v9  ;;  %1626 = vmatmul.mubr.bf16.vlgmr.msra.gmra.mrb[16].mxu1 %v2801_v9  ;;  %v757_v9 = vrot.slane %v2823_v24, %v471_v26 }
 0x297   : > { %1582 = vmatprep.mubr.bf16.mxu0 %v2807_v42  ;;  %1635 = vmatprep.mubr.bf16.mxu1 %v2807_v42  ;;  %v761_v42 = vrot.slane %v2823_v24, %v475_v57 }
 0x29e   : > { %1583 = vmatmul.mubr.bf16.gmra.mrb[16].mxu0 %v2805_v38  ;;  %1636 = vmatmul.mubr.bf16.gmra.mrb[20].mxu1 %v2805_v38  ;;  %v769_v38 = vrot.slane %v2823_v24, %v768_v25  ;;  %v780_v25 = vsub.s32 6, %v2790_v55 }
 0x329   : > { %v1468_v28 = vpop.f32.mrb[4].mxu0  ;;  %v1521_v30 = vpop.f32.mrb[8].mxu1 }
 0x32a   : > { %v1469_v31 = vadd.f32 %v1468_v28, %v757_v9  ;;  %v1522_v33 = vadd.f32 %v1521_v30, %v765_v27  ;;  %v1470_v34 = vpop.f32.mrb[5].mxu0  ;;  %v1523_v36 = vpop.f32.mrb[9].mxu1 }
 0x32b   : > { %v1471_v37 = vadd.f32 %v1470_v34, %v761_v42  ;;  %v1524_v39 = vadd.f32 %v1523_v36, %v769_v38  ;;  %v1472_v40 = vpop.f32.mrb[6].mxu0  ;;  %v1525_v41 = vpop.f32.mrb[10].mxu1 }
 0x32c   : > { %2246 = vtanh.f32 %v1469_v31  ;;  %v1473_v26 = vadd.f32 %v1472_v40, %v757_v9  ;;  %v1474_v43 = vpop.f32.mrb[7].mxu0  ;;  %v1527_v44 = vpop.f32.mrb[11].mxu1  ;;  %v1526_v45 = vadd.f32 %v1525_v41, %v765_v27 }
 0x32d   : > { %2248 = vtanh.f32 %v1522_v33  ;;  %v1475_v57 = vadd.f32 %v1474_v43, %v761_v42  ;;  %v1528_v46 = vadd.f32 %v1527_v44, %v769_v38 }
 0x32e   : > { %2250 = vtanh.f32 %v1471_v37 }
 0x32f   : > { %2252 = vtanh.f32 %v1524_v39 }
 0x330   : > { %2254 = vtanh.f32 %v1473_v26 }
 0x331   : > { %2256 = vtanh.f32 %v1526_v45  ;;  %v1478_v47 = vpop.f32.mrb[8].mxu0  ;;  %v1531_v48 = vpop.f32.mrb[12].mxu1 }
 0x332   : > { %2258 = vtanh.f32 %v1475_v57  ;;  %v1479_v49 = vadd.f32 %v1478_v47, %v757_v9  ;;  %v1532_v50 = vadd.f32 %v1531_v48, %v765_v27  ;;  %v1480_v51 = vpop.f32.mrb[9].mxu0  ;;  %v1533_v52 = vpop.f32.mrb[13].mxu1 }
 0x333   : > { %2260 = vtanh.f32 %v1528_v46  ;;  %v1481_v53 = vadd.f32 %v1480_v51, %v761_v42  ;;  %v1534_v54 = vadd.f32 %v1533_v52, %v769_v38  ;;  %v1482_v56 = vpop.f32.mrb[10].mxu0  ;;  %v1535_v29 = vpop.f32.mrb[14].mxu1 }
 0x334   : > { %2262 = vtanh.f32 %v1479_v49  ;;  %v1483_v32 = vadd.f32 %v1482_v56, %v757_v9  ;;  %v1484_v35 = vpop.f32.mrb[11].mxu0  ;;  %v1537_v58 = vpop.f32.mrb[15].mxu1  ;;  %v1536_v59 = vadd.f32 %v1535_v29, %v765_v27  ;;  %v776_v9 = vsub.s32 5, %v2790_v55 }
 0x335   : > { %2264 = vtanh.f32 %v1532_v50  ;;  %v1485_v61 = vadd.f32 %v1484_v35, %v761_v42  ;;  %v1538_v63 = vadd.f32 %v1537_v58, %v769_v38  ;;  %v784_v27 = vsub.s32 7, %v2790_v55 }
 0x336   : > { %v2247_v60 = vpop.eup %2246  ;;  %2266 = vtanh.f32 %v1481_v53  ;;  %v773_v42 = vrot.slane %v2823_v24, %v772_v23  ;;  %v781_v38 = vrot.slane %v2823_v24, %v780_v25  ;;  %v777_v28 = vrot.slane %v2823_v24, %v776_v9 }
 0x337   : > { %v2249_v62 = vpop.eup %2248  ;;  %2268 = vtanh.f32 %v1534_v54  ;;  %v785_v30 = vrot.slane %v2823_v24, %v784_v27 }
 0x338   : > { %v2251_v0 = vpop.eup %2250  ;;  %2270 = vtanh.f32 %v1483_v32 }
 0x339   : > { %v2253_v1 = vpop.eup %2252  ;;  %v2096_v2 = vpack.c.bf16 %v2251_v0, %v2247_v60  ;;  %2272 = vtanh.f32 %v1536_v59 }
 0x33a   : > { %v2255_v3 = vpop.eup %2254  ;;  %v2097_v4 = vpack.c.bf16 %v2253_v1, %v2249_v62  ;;  %2274 = vtanh.f32 %v1485_v61 }
 0x33b   : > { %v2257_v5 = vpop.eup %2256  ;;  %1774 = vst [vmem:[%s2835_s18] sm:$0xff] %v2096_v2  ;;  %2276 = vtanh.f32 %v1538_v63 }
 0x33c   : > { %v2259_v6 = vpop.eup %2258  ;;  %1775 = vst [vmem:[%s2835_s18 + $0x8] sm:$0xff] %v2097_v4 }
 0x33d   : > { %v2261_v7 = vpop.eup %2260  ;;  %v2100_v8 = vpack.c.bf16 %v2259_v6, %v2255_v3 }
 0x33e   : > { %v2263_v10 = vpop.eup %2262  ;;  %v2101_v11 = vpack.c.bf16 %v2261_v7, %v2257_v5 }
 0x33f   : > { %v2265_v12 = vpop.eup %2264  ;;  %1778 = vst [vmem:[%s2835_s18 + $0x20] sm:$0xff] %v2100_v8 }
 0x340   : > { %v2267_v13 = vpop.eup %2266  ;;  %1779 = vst [vmem:[%s2835_s18 + $0x28] sm:$0xff] %v2101_v11 }
 0x341   : > { %v2269_v14 = vpop.eup %2268  ;;  %v2104_v15 = vpack.c.bf16 %v2267_v13, %v2263_v10 }
 0x342   : > { %v2271_v16 = vpop.eup %2270  ;;  %v2105_v17 = vpack.c.bf16 %v2269_v14, %v2265_v12 }
 0x343   : > { %v2273_v18 = vpop.eup %2272  ;;  %1782 = vst [vmem:[%s2835_s18 + $0x40] sm:$0xff] %v2104_v15 }
 0x344   : > { %v2275_v19 = vpop.eup %2274  ;;  %1783 = vst [vmem:[%s2835_s18 + $0x48] sm:$0xff] %v2105_v17 }
 0x345   : > { %v2277_v20 = vpop.eup %2276  ;;  %v2108_v21 = vpack.c.bf16 %v2275_v19, %v2271_v16 }
 0x346   : > { %v2109_v22 = vpack.c.bf16 %v2277_v20, %v2273_v18 }
 0x347   : > { %1786 = vst [vmem:[%s2835_s18 + $0x60] sm:$0xff] %v2108_v21 }
 0x348   : > { %1787 = vst [vmem:[%s2835_s18 + $0x68] sm:$0xff] %v2109_v22 }
 0x369   : > { %v1574_v31 = vpop.f32.mrb[12].mxu0  ;;  %v1627_v33 = vpop.f32.mrb[16].mxu1 }
 0x36a   : > { %v1575_v34 = vadd.f32 %v1574_v31, %v773_v42  ;;  %v1628_v36 = vadd.f32 %v1627_v33, %v781_v38  ;;  %v1576_v37 = vpop.f32.mrb[13].mxu0  ;;  %v1629_v39 = vpop.f32.mrb[17].mxu1 }
 0x36b   : > { %v1577_v40 = vadd.f32 %v1576_v37, %v777_v28  ;;  %v1630_v41 = vadd.f32 %v1629_v39, %v785_v30  ;;  %v1578_v26 = vpop.f32.mrb[14].mxu0  ;;  %v1631_v43 = vpop.f32.mrb[18].mxu1 }
 0x36c   : > { %2278 = vtanh.f32 %v1575_v34  ;;  %v1579_v55 = vadd.f32 %v1578_v26, %v773_v42  ;;  %v1580_v44 = vpop.f32.mrb[15].mxu0  ;;  %v1633_v45 = vpop.f32.mrb[19].mxu1  ;;  %v1632_v57 = vadd.f32 %v1631_v43, %v781_v38 }
 0x36d   : > { %2280 = vtanh.f32 %v1628_v36  ;;  %v1581_v46 = vadd.f32 %v1580_v44, %v777_v28  ;;  %v1634_v24 = vadd.f32 %v1633_v45, %v785_v30 }
 0x36e   : > { %2282 = vtanh.f32 %v1577_v40 }
 0x36f   : > { %2284 = vtanh.f32 %v1630_v41 }
 0x370   : > { %2286 = vtanh.f32 %v1579_v55 }
 0x371   : > { %2288 = vtanh.f32 %v1632_v57  ;;  %v1584_v47 = vpop.f32.mrb[16].mxu0  ;;  %v1637_v48 = vpop.f32.mrb[20].mxu1 }
 0x372   : > { %2290 = vtanh.f32 %v1581_v46  ;;  %v1585_v49 = vadd.f32 %v1584_v47, %v773_v42  ;;  %v1638_v50 = vadd.f32 %v1637_v48, %v781_v38  ;;  %v1586_v51 = vpop.f32.mrb[17].mxu0  ;;  %v1639_v52 = vpop.f32.mrb[21].mxu1 }
 0x373   : > { %2292 = vtanh.f32 %v1634_v24  ;;  %v1587_v53 = vadd.f32 %v1586_v51, %v777_v28  ;;  %v1640_v54 = vadd.f32 %v1639_v52, %v785_v30  ;;  %v1588_v56 = vpop.f32.mrb[18].mxu0  ;;  %v1641_v29 = vpop.f32.mrb[22].mxu1 }
 0x374   : > { %2294 = vtanh.f32 %v1585_v49  ;;  %v1589_v32 = vadd.f32 %v1588_v56, %v773_v42  ;;  %v1590_v35 = vpop.f32.mrb[19].mxu0  ;;  %v1643_v58 = vpop.f32.mrb[23].mxu1  ;;  %v1642_v59 = vadd.f32 %v1641_v29, %v781_v38 }
 0x375   : > { %2296 = vtanh.f32 %v1638_v50  ;;  %v1591_v61 = vadd.f32 %v1590_v35, %v777_v28  ;;  %v1644_v63 = vadd.f32 %v1643_v58, %v785_v30 }
 0x376   : > { %v2279_v60 = vpop.eup %2278  ;;  %2298 = vtanh.f32 %v1587_v53 }
 0x377   : > { %v2281_v62 = vpop.eup %2280  ;;  %2300 = vtanh.f32 %v1640_v54 }
 0x378   : > { %v2283_v0 = vpop.eup %2282  ;;  %2302 = vtanh.f32 %v1589_v32 }
 0x379   : > { %v2285_v1 = vpop.eup %2284  ;;  %v2098_v2 = vpack.c.bf16 %v2283_v0, %v2279_v60  ;;  %2304 = vtanh.f32 %v1642_v59 }
 0x37a   : > { %v2287_v3 = vpop.eup %2286  ;;  %v2099_v4 = vpack.c.bf16 %v2285_v1, %v2281_v62  ;;  %2306 = vtanh.f32 %v1591_v61 }
 0x37b   : > { %v2289_v5 = vpop.eup %2288  ;;  %1776 = vst [vmem:[%s2835_s18 + $0x10] sm:$0xff] %v2098_v2  ;;  %2308 = vtanh.f32 %v1644_v63 }
 0x37c   : > { %v2291_v6 = vpop.eup %2290  ;;  %1777 = vst [vmem:[%s2835_s18 + $0x18] sm:$0xff] %v2099_v4 }
 0x37d   : > { %v2293_v7 = vpop.eup %2292  ;;  %v2102_v8 = vpack.c.bf16 %v2291_v6, %v2287_v3 }
 0x37e   : > { %v2295_v10 = vpop.eup %2294  ;;  %v2103_v11 = vpack.c.bf16 %v2293_v7, %v2289_v5 }
 0x37f   : > { %v2297_v12 = vpop.eup %2296  ;;  %1780 = vst [vmem:[%s2835_s18 + $0x30] sm:$0xff] %v2102_v8 }
 0x380   : > { %v2299_v13 = vpop.eup %2298  ;;  %1781 = vst [vmem:[%s2835_s18 + $0x38] sm:$0xff] %v2103_v11 }
 0x381   : > { %v2301_v14 = vpop.eup %2300  ;;  %v2106_v15 = vpack.c.bf16 %v2299_v13, %v2295_v10 }
 0x382   : > { %v2303_v16 = vpop.eup %2302  ;;  %v2107_v17 = vpack.c.bf16 %v2301_v14, %v2297_v12 }
 0x383   : > { %v2305_v18 = vpop.eup %2304  ;;  %1784 = vst [vmem:[%s2835_s18 + $0x50] sm:$0xff] %v2106_v15 }
 0x384   : > { %v2307_v19 = vpop.eup %2306  ;;  %1785 = vst [vmem:[%s2835_s18 + $0x58] sm:$0xff] %v2107_v17 }
 0x385   : > { %v2309_v20 = vpop.eup %2308  ;;  %v2110_v21 = vpack.c.bf16 %v2307_v19, %v2303_v16 }
 0x386   : > { %v2111_v22 = vpack.c.bf16 %v2309_v20, %v2305_v18 }
 0x387   : > { %1788 = vst [vmem:[%s2835_s18 + $0x70] sm:$0xff] %v2110_v21 }
 0x388   : > { %1789 = vst [vmem:[%s2835_s18 + $0x78] sm:$0xff] %v2111_v22 }
 0x389   : > { %2437 = shalt.err (!%p2434_p4)
}
 0x38a   : > { %s2438_s10 = scalar_lea.hbm %s2864_s1, 2048  ;;  %s2442_s15 = scalar_lea.hbm %s2919_s7, 4096 }
 0x38b   : > { %p2439_p9 = scmp.ne.s32.totalorder %s2864_s1, %s2438_s10  ;;  %p2443_p8 = scmp.lt.u32.totalorder %s2864_s1, %s2919_s7 }
 0x38c   : > { %p2444_p13 = scmp.lt.u32.totalorder %s2442_s15, %s2438_s10  ;;  %p2446_p10 = scmp.lt.u32.totalorder %s2438_s10, %s2864_s1 }
 0x38d   : > { %p2440_p0 = pnand %p2439_p9, %p2699_p5 }
 0x38e   : > { %p2445_p6 = por %p2444_p13, %p2443_p8 }
 0x38f   : > { %p2441_p11 = pneg %p2440_p0 }
 0x390   : > { %p2447_p3 = por %p2446_p10, %p2445_p6 }
 0x392   : > { %p2448_p7 = pnand %p2447_p3, %p2441_p11 }
 0x394   : > { %2451 = shalt.err (!%p2448_p7)
}
 0x395   : > { %s2512_s14 = smov 512   ;;  %s2513_s11 = smov 32  }
 0x396   : > { %2146 = dma.vmem_to_hbm [thread:$0]  (%p2699_p5), %s2866_s17, 2048, %s2864_s1, %s1791_s28, %s2512_s14, %s2512_s14, %s2513_s11  }
 0x397 PF: > { %s1820_s12 = sand.u32 1, %s2486_s24   ;;  %p2939_p12 = scmp.ne.s32.totalorder %s2925_s8, 0 }
 0x398   : > { %p2940_p2 = scmp.ge.s32.totalorder %s2498_s27, 2  ;;  %s1821_s30 = scalar_lea.sflag [#allocation4], %s1820_s12 }
 0x39a   : > { %p2163_p1 = pnand %p2940_p2, %p2939_p12 }
 0x39c   : > { %2481 = dma.done.wait (!%p2163_p1), %s1821_s30, 2048  }
 0x39d   : > { %2483 = vsyncadd (!%p2163_p1), %s1821_s30, 4294965248  ;;  %p22_p4 = scmp.ge.s32.totalorder %s2685_s16, 4   ;;  %s2941_s24 = smov %s2490_s25 }
 0x39e   : > { %s2942_s25 = smov %s2494_s26  ;;  %s2943_s26 = smov %s2695_s21 }
 0x39f   : > { %s2944_s27 = smov %s2685_s16  ;;  %24 = sbr.rel (!%p22_p4) target bundleno = 9 (0x9), region = 105 }
 0x3a6   :  { %1826 = vsyncpa [#allocation3], 1 }
 0x3a7   :  { %1828 = vsyncpa [#allocation3 + $0x1], 1 }
 0x3a8   :  { %1829 = vsyncpa [#allocation6], 1 }
 0x3a9   :  { %1830 = vsyncpa [#allocation9], 1 }
 0x3aa   :  { %1831 = vsyncpa [#allocation4], 1 }
 0x3ab   :  { %1833 = vsyncpa [#allocation4 + $0x1], 1 }

</bundles_post_ra>
